<compile_context>
chip_gen: v7x
topology: tpu7x:2x2x1
jax: 0.10.0
libtpu: 0.0.40
codegen_flags: <defaults>
</compile_context>

<pallas_src>
import functools

import jax
import jax.numpy as jnp
from jax.experimental import pallas as pl
from jax.experimental.pallas import tpu as pltpu


def criterion_kernel(fdata_ref, rc_ref, itgt_ref, rewards_ref, part_ref, *, K):
    """One batch block of TB lanes.

    fdata_ref : [K, TB]   stacked act/color/shape log-probs (model dtype), lane = sample
    rc_ref    : [4, TB]   f32: row_out, col_out, row_tgt, col_tgt
    itgt_ref  : [3, TB]   i32: act_tgt, color_tgt + A, shape_tgt + A + C (pre-offset)
    rewards_ref : [1, TB] f32 out: uncentered rewards  -(|drow| + |dcol|)
    part_ref    : [1,128] f32 out: lane0 = sum(per-sample loss), lane1 = sum(|drow|+|dcol|)
    """
    TB = fdata_ref.shape[1]

    # Upcast in-register (free VPU work; keeps the HBM->VMEM DMA at model width).
    logp = fdata_ref[...].astype(jnp.float32)                       # [K, TB]
    tgt = itgt_ref[...]                                             # [3, TB]

    # Single fused one-hot gather over the stacked class axis (sublanes).
    # where-select avoids the 0 * (-inf) = NaN hazard of a one-hot multiply.
    cls_iota = jax.lax.broadcasted_iota(jnp.int32, (K, TB), 0)
    sel = ((cls_iota == tgt[0:1, :])
           | (cls_iota == tgt[1:2, :])
           | (cls_iota == tgt[2:3, :]))
    picked = jnp.sum(jnp.where(sel, logp, 0.0), axis=0, keepdims=True)   # [1, TB]

    rc = rc_ref[...].astype(jnp.float32)                             # [4, TB]
    abs_rc = (jnp.abs(rc[0:1, :] - rc[2:3, :])
              + jnp.abs(rc[1:2, :] - rc[3:4, :]))                    # [1, TB]

    # Lane-dense, unmasked store (TB is a multiple of 128). Pad lanes hold 0.
    rewards_ref[...] = -abs_rc

    # One cross-lane reduce for both partial sums (loss numerator & rewards sum).
    stacked = jnp.concatenate([abs_rc - picked, abs_rc], axis=0)      # [2, TB]
    sums = jnp.sum(stacked, axis=1, keepdims=True)                    # [2, 1]
    lane = jax.lax.broadcasted_iota(jnp.int32, (1, 128), 1)
    part_ref[...] = jnp.where(lane == 0, sums[0:1, :],
                              jnp.where(lane == 1, sums[1:2, :], 0.0))


def shape2d_obj_criterion(model_out, act_target, target_obj, ref_obj=None, *,
                          block_b=1024):
    """JAX/Pallas equivalent of Shape2DObjCriterion.forward (ref_obj is unused)."""
    act_out, color_out, shape_out, row_out, col_out = model_out
    B, A = act_out.shape
    C = color_out.shape[1]
    S = shape_out.shape[1]
    K = A + C + S

    # Batch tiling: lane axis padded to a multiple of 128 (unmasked stores).
    # Small B -> a single exactly-padded block; large B -> block_b-lane blocks that
    # BlockSpec double-buffers and (on v7x) shards across both TensorCores.
    if B <= block_b:
        tb = max(128, -(-B // 128) * 128)
    else:
        tb = block_b
    nb = -(-B // tb)
    b_pad = nb * tb
    pad = b_pad - B

    # Three lane-major slabs. The big log-prob slab keeps the heads' own dtype
    # (no silent promotion to f32 by row/col); row/col live in a tiny f32 slab.
    head_dtype = jnp.result_type(act_out.dtype, color_out.dtype, shape_out.dtype)
    fdata = jnp.concatenate([act_out.T.astype(head_dtype),
                             color_out.T.astype(head_dtype),
                             shape_out.T.astype(head_dtype)], axis=0)        # [K, B]
    rc = jnp.stack([row_out.astype(jnp.float32),
                    col_out.astype(jnp.float32),
                    target_obj[:, 2].astype(jnp.float32),
                    target_obj[:, 3].astype(jnp.float32)], axis=0)           # [4, B]
    itgt = jnp.stack([act_target.astype(jnp.int32),
                      target_obj[:, 0].astype(jnp.int32) + A,
                      target_obj[:, 1].astype(jnp.int32) + (A + C)], axis=0)  # [3, B]

    if pad:
        # Zero padding => pad lanes contribute exactly 0 to picked, |drow|+|dcol|,
        # and every partial sum; true 1/B is applied below.
        fdata = jnp.pad(fdata, ((0, 0), (0, pad)))
        rc = jnp.pad(rc, ((0, 0), (0, pad)))
        itgt = jnp.pad(itgt, ((0, 0), (0, pad)))

    kernel = functools.partial(criterion_kernel, K=K)
    rewards_raw, partials = pl.pallas_call(
        kernel,
        grid=(nb,),
        in_specs=[pl.BlockSpec((K, tb), lambda i: (0, i)),
                  pl.BlockSpec((4, tb), lambda i: (0, i)),
                  pl.BlockSpec((3, tb), lambda i: (0, i))],
        out_specs=(pl.BlockSpec((1, tb), lambda i: (0, i)),
                   pl.BlockSpec((1, 128), lambda i: (i, 0))),
        out_shape=(jax.ShapeDtypeStruct((1, b_pad), jnp.float32),   # uncentered rewards
                   jax.ShapeDtypeStruct((nb, 128), jnp.float32)),   # per-block partials
        compiler_params=pltpu.CompilerParams(
            dimension_semantics=("parallel",)),
    )(fdata, rc, itgt)

    # Tiny wrapper-side finalize (scalars + one elementwise subtract over B floats).
    inv_b = 1.0 / B
    loss = jnp.sum(partials[:, 0]) * inv_b
    rew_mean = -jnp.sum(partials[:, 1]) * inv_b          # mean of uncentered rewards
    rewards = rewards_raw[0, :B] - rew_mean
    return loss, rewards


def _reference(model_out, act_target, target_obj):
    # Pure-JAX reference of the PyTorch forward, for validation only.
    act_out, color_out, shape_out, row_out, col_out = model_out
    B = act_out.shape[0]

    def nll(logp, tgt):
        return -jnp.mean(logp[jnp.arange(B), tgt])

    color_t = target_obj[:, 0]
    shape_t = target_obj[:, 1]
    row_t = target_obj[:, 2].astype(jnp.float32)
    col_t = target_obj[:, 3].astype(jnp.float32)

    loss = (nll(act_out, act_target) + nll(color_out, color_t)
            + nll(shape_out, shape_t)
            + jnp.mean(jnp.abs(row_out - row_t))
            + jnp.mean(jnp.abs(col_out - col_t)))
    rewards = -(jnp.abs(row_out - row_t) + jnp.abs(col_out - col_t))
    rewards = rewards - rewards.mean()
    return loss, rewards


if __name__ == "__main__":
    key = jax.random.PRNGKey(0)
    B, A, C, S = 8, 5, 4, 3           # batch, num actions, colors, shapes
    GRID = 16                          # row/col coordinates live in [0, GRID)

    k = jax.random.split(key, 8)
    act_out = jax.nn.log_softmax(jax.random.normal(k[0], (B, A), jnp.float32), axis=-1)
    color_out = jax.nn.log_softmax(jax.random.normal(k[1], (B, C), jnp.float32), axis=-1)
    shape_out = jax.nn.log_softmax(jax.random.normal(k[2], (B, S), jnp.float32), axis=-1)
    row_out = jax.random.uniform(k[3], (B,), jnp.float32, 0.0, GRID)
    col_out = jax.random.uniform(k[4], (B,), jnp.float32, 0.0, GRID)

    act_target = jax.random.randint(k[5], (B,), 0, A, jnp.int32)
    target_obj = jnp.stack([
        jax.random.randint(k[6], (B,), 0, C, jnp.int32),
        jax.random.randint(k[7], (B,), 0, S, jnp.int32),
        jax.random.randint(k[5], (B,), 0, GRID, jnp.int32),
        jax.random.randint(k[6], (B,), 0, GRID, jnp.int32),
    ], axis=1)                         # [B, 4] = (color, shape, row, col)
    ref_obj = jnp.zeros((B, 4), jnp.int32)   # unused by the forward pass

    model_out = (act_out, color_out, shape_out, row_out, col_out)

    loss, rewards = shape2d_obj_criterion(model_out, act_target, target_obj, ref_obj)
    loss, rewards = jax.block_until_ready((loss, rewards))

    ref_loss, ref_rewards = _reference(model_out, act_target, target_obj)
    assert jnp.allclose(loss, ref_loss, atol=1e-5, rtol=1e-5)
    assert jnp.allclose(rewards, ref_rewards, atol=1e-5, rtol=1e-5)

    print("KERNEL_OK")
</pallas_src>

<mosaic_0001>
module attributes {stable_mosaic.version = 11 : i64} {
  func.func @criterion_kernel(%arg0: i32, %arg1: memref<12x128xf32, #tpu.memory_space<vmem>>, %arg2: memref<4x128xf32, #tpu.memory_space<vmem>>, %arg3: memref<3x128xi32, #tpu.memory_space<vmem>>, %arg4: memref<1x128xf32, #tpu.memory_space<vmem>>, %arg5: memref<1x128xf32, #tpu.memory_space<vmem>>) attributes {dimension_semantics = [#tpu.dimension_semantics<parallel>], iteration_bounds = array<i64: 1>, scalar_prefetch = 0 : i64, scratch_operands = 0 : i64, tpu.core_type = #tpu.core_type<tc>, window_params = [{transform_indices = @transform_0, window_bounds = array<i64: 12, 128>}, {transform_indices = @transform_1, window_bounds = array<i64: 4, 128>}, {transform_indices = @transform_2, window_bounds = array<i64: 3, 128>}, {transform_indices = @transform_3, window_bounds = array<i64: 1, 128>}, {transform_indices = @transform_4, window_bounds = array<i64: 1, 128>}]} {
    %c0 = arith.constant 0 : index
    %c0_0 = arith.constant 0 : index
    %0 = vector.load %arg1[%c0, %c0_0] : memref<12x128xf32, #tpu.memory_space<vmem>>, vector<12x128xf32>
    %c0_1 = arith.constant 0 : index
    %c0_2 = arith.constant 0 : index
    %1 = vector.load %arg3[%c0_1, %c0_2] : memref<3x128xi32, #tpu.memory_space<vmem>>, vector<3x128xi32>
    %2 = tpu.iota {dimensions = array<i32: 0>} : vector<12x128xi32>
    %3 = vector.extract_strided_slice %1 {offsets = [0, 0], sizes = [1, 128], strides = [1, 1]} : vector<3x128xi32> to vector<1x128xi32>
    %4 = vector.broadcast %3 : vector<1x128xi32> to vector<12x128xi32>
    %5 = arith.cmpi eq, %2, %4 : vector<12x128xi32>
    %6 = vector.extract_strided_slice %1 {offsets = [1, 0], sizes = [1, 128], strides = [1, 1]} : vector<3x128xi32> to vector<1x128xi32>
    %7 = vector.broadcast %6 : vector<1x128xi32> to vector<12x128xi32>
    %8 = arith.cmpi eq, %2, %7 : vector<12x128xi32>
    %9 = arith.ori %5, %8 : vector<12x128xi1>
    %10 = vector.extract_strided_slice %1 {offsets = [2, 0], sizes = [1, 128], strides = [1, 1]} : vector<3x128xi32> to vector<1x128xi32>
    %11 = vector.broadcast %10 : vector<1x128xi32> to vector<12x128xi32>
    %12 = arith.cmpi eq, %2, %11 : vector<12x128xi32>
    %13 = arith.ori %9, %12 : vector<12x128xi1>
    %cst = arith.constant 0.000000e+00 : f32
    %14 = vector.broadcast %cst : f32 to vector<12x128xf32>
    %15 = arith.select %13, %0, %14 : vector<12x128xi1>, vector<12x128xf32>
    %cst_3 = arith.constant dense<0.000000e+00> : vector<128xf32>
    %16 = vector.multi_reduction <add>, %15, %cst_3 [0] : vector<12x128xf32> to vector<128xf32>
    %17 = vector.shape_cast %16 : vector<128xf32> to vector<1x128xf32>
    %c0_4 = arith.constant 0 : index
    %c0_5 = arith.constant 0 : index
    %18 = vector.load %arg2[%c0_4, %c0_5] : memref<4x128xf32, #tpu.memory_space<vmem>>, vector<4x128xf32>
    %19 = vector.extract_strided_slice %18 {offsets = [0, 0], sizes = [1, 128], strides = [1, 1]} : vector<4x128xf32> to vector<1x128xf32>
    %20 = vector.extract_strided_slice %18 {offsets = [2, 0], sizes = [1, 128], strides = [1, 1]} : vector<4x128xf32> to vector<1x128xf32>
    %21 = arith.subf %19, %20 : vector<1x128xf32>
    %22 = math.absf %21 : vector<1x128xf32>
    %23 = vector.extract_strided_slice %18 {offsets = [1, 0], sizes = [1, 128], strides = [1, 1]} : vector<4x128xf32> to vector<1x128xf32>
    %24 = vector.extract_strided_slice %18 {offsets = [3, 0], sizes = [1, 128], strides = [1, 1]} : vector<4x128xf32> to vector<1x128xf32>
    %25 = arith.subf %23, %24 : vector<1x128xf32>
    %26 = math.absf %25 : vector<1x128xf32>
    %27 = arith.addf %22, %26 : vector<1x128xf32>
    %cst_6 = arith.constant 0.000000e+00 : f32
    %28 = vector.broadcast %cst_6 : f32 to vector<1x128xf32>
    %29 = arith.subf %28, %27 : vector<1x128xf32>
    %c0_7 = arith.constant 0 : index
    %c0_8 = arith.constant 0 : index
    %30 = vector.load %arg4[%c0_7, %c0_8] : memref<1x128xf32, #tpu.memory_space<vmem>>, vector<1x128xf32>
    tpu.vector_store %arg4[%c0_7, %c0_8], %29 {strides = array<i32>} : memref<1x128xf32, #tpu.memory_space<vmem>>, vector<1x128xf32>,
    %31 = arith.subf %27, %17 : vector<1x128xf32>
    %32 = tpu.concatenate %31, %27 in 0 : vector<1x128xf32>, vector<1x128xf32> -> vector<2x128xf32>
    %cst_9 = arith.constant dense<0.000000e+00> : vector<2xf32>
    %33 = vector.multi_reduction <add>, %32, %cst_9 [1] : vector<2x128xf32> to vector<2xf32>
    %34 = vector.shape_cast %33 : vector<2xf32> to vector<2x1xf32>
    %35 = tpu.iota {dimensions = array<i32: 1>} : vector<1x128xi32>
    %c0_i32 = arith.constant 0 : i32
    %36 = vector.broadcast %c0_i32 : i32 to vector<1x128xi32>
    %37 = arith.cmpi eq, %35, %36 : vector<1x128xi32>
    %38 = vector.extract_strided_slice %34 {offsets = [0, 0], sizes = [1, 1], strides = [1, 1]} : vector<2x1xf32> to vector<1x1xf32>
    %c1_i32 = arith.constant 1 : i32
    %39 = vector.broadcast %c1_i32 : i32 to vector<1x128xi32>
    %40 = arith.cmpi eq, %35, %39 : vector<1x128xi32>
    %41 = vector.extract_strided_slice %34 {offsets = [1, 0], sizes = [1, 1], strides = [1, 1]} : vector<2x1xf32> to vector<1x1xf32>
    %cst_10 = arith.constant 0.000000e+00 : f32
    %42 = vector.shape_cast %41 : vector<1x1xf32> to vector<1x1xf32>
    %43 = vector.broadcast %42 : vector<1x1xf32> to vector<1x128xf32>
    %44 = vector.broadcast %cst_10 : f32 to vector<1x128xf32>
    %45 = arith.select %40, %43, %44 : vector<1x128xi1>, vector<1x128xf32>
    %46 = vector.shape_cast %38 : vector<1x1xf32> to vector<1x1xf32>
    %47 = vector.broadcast %46 : vector<1x1xf32> to vector<1x128xf32>
    %48 = arith.select %37, %47, %45 : vector<1x128xi1>, vector<1x128xf32>
    %c0_11 = arith.constant 0 : index
    %c0_12 = arith.constant 0 : index
    %49 = vector.load %arg5[%c0_11, %c0_12] : memref<1x128xf32, #tpu.memory_space<vmem>>, vector<1x128xf32>
    tpu.vector_store %arg5[%c0_11, %c0_12], %48 {strides = array<i32>} : memref<1x128xf32, #tpu.memory_space<vmem>>, vector<1x128xf32>,
    return
  }
  func.func @transform_0(%arg0: i32) -> (i32, i32) {
    %c0_i32 = arith.constant 0 : i32
    %c0_i32_0 = arith.constant 0 : i32
    return %c0_i32, %arg0 : i32, i32
  }
  func.func @transform_1(%arg0: i32) -> (i32, i32) {
    %c0_i32 = arith.constant 0 : i32
    %c0_i32_0 = arith.constant 0 : i32
    return %c0_i32, %arg0 : i32, i32
  }
  func.func @transform_2(%arg0: i32) -> (i32, i32) {
    %c0_i32 = arith.constant 0 : i32
    %c0_i32_0 = arith.constant 0 : i32
    return %c0_i32, %arg0 : i32, i32
  }
  func.func @transform_3(%arg0: i32) -> (i32, i32) {
    %c0_i32 = arith.constant 0 : i32
    %c0_i32_0 = arith.constant 0 : i32
    return %c0_i32, %arg0 : i32, i32
  }
  func.func @transform_4(%arg0: i32) -> (i32, i32) {
    %c0_i32 = arith.constant 0 : i32
    %c0_i32_0 = arith.constant 0 : i32
    return %arg0, %c0_i32 : i32, i32
  }
}

</mosaic_0001>

<bundles_post_ra>
// kernel: tpu_custom_call.1
= control target key start
LH: loop header
LB: loop body
LE: loop exit
PB: predicated region body
PF: predicated region fallthrough
CT: control target
= control target key end

     0   :  { %10 = vsyncpa [#allocation3], 0  ;;  %s331_s0 = inlined_call_operand.hbm [shape: f32[12,128], index: 0, kind: input, shape index: {}]   ;;  %s332_s1 = inlined_call_operand.hbm [shape: f32[4,128], index: 1, kind: input, shape index: {}]   ;;  %s333_s2 = inlined_call_operand.vmem [shape: s32[3,128], index: 2, kind: input, shape index: {}]   ;;  %s334_s3 = inlined_call_operand.hbm [shape: f32[1,128], index: 3, kind: output, shape index: {0}]   ;;  %s335_s4 = inlined_call_operand.hbm [shape: f32[1,128], index: 4, kind: output, shape index: {1}]  }
   0x1   :  { %11 = vsyncpa [#allocation6], 0 }
   0x2   :  { %12 = vsyncpa [#allocation4], 0 }
   0x3   :  { %13 = vsyncpa [#allocation9], 0  ;;  %s247_s15 = smov [#allocation2]   ;;  %s151_s19 = scalar_lea.hbm %s331_s0, 256 }
   0x4   :  { %s19_s16 = sshll.u32 %s247_s15, 4  ;;  %p152_p0 = scmp.ne.s32.totalorder %s331_s0, %s151_s19  ;;  %s20_s16 = int_to_ptr.vmem [resolvable:$true] %s19_s16 }
   0x5   :  { %p155_p1 = scmp.lt.u32.totalorder %s151_s19, %s331_s0 }
   0x7   :  { %p157_p2 = pnand %p155_p1, %p152_p0 }
   0x9   :  { %160 = shalt.err (!%p157_p2)
}
   0xa   :  { %s161_s24 = scalar_lea.vmem %s20_s16, 256  ;;  %p166_p4 = scmp.lt.s32.totalorder %s20_s16, %s20_s16 }
   0xb   :  { %p162_p3 = scmp.ne.s32.totalorder %s20_s16, %s161_s24  ;;  %p167_p5 = scmp.lt.s32.totalorder %s161_s24, %s161_s24 }
   0xd   :  { %p168_p6 = por %p167_p5, %p166_p4 }
   0xf   :  { %p169_p7 = pnand %p168_p6, %p162_p3 }
  0x11   :  { %172 = shalt.err (!%p169_p7)
}
  0x12   :  { %s248_s25 = smov 128   ;;  %s249_s26 = smov 8  }
  0x13   :  { %25 = dma.hbm_to_vmem [thread:$0]  %s331_s0, 256, %s20_s16, [#allocation3], %s248_s25, %s248_s25, %s249_s26  }
  0x14   :  { %s250_s29 = smov [#allocation5]   ;;  %s173_s7 = scalar_lea.hbm %s332_s1, 64 }
  0x15   :  { %s32_s30 = sshll.u32 %s250_s29, 4  ;;  %p174_p8 = scmp.ne.s32.totalorder %s332_s1, %s173_s7  ;;  %s33_s30 = int_to_ptr.vmem [resolvable:$true] %s32_s30 }
  0x16   :  { %p177_p9 = scmp.lt.u32.totalorder %s173_s7, %s332_s1 }
  0x18   :  { %p179_p10 = pnand %p177_p9, %p174_p8 }
  0x1a   :  { %182 = shalt.err (!%p179_p10)
}
  0x1b   :  { %s183_s12 = scalar_lea.vmem %s33_s30, 64  ;;  %p188_p12 = scmp.lt.s32.totalorder %s33_s30, %s33_s30 }
  0x1c   :  { %p184_p11 = scmp.ne.s32.totalorder %s33_s30, %s183_s12  ;;  %p189_p13 = scmp.lt.s32.totalorder %s183_s12, %s183_s12 }
  0x1e   :  { %p190_p0 = por %p189_p13, %p188_p12 }
  0x20   :  { %p191_p1 = pnand %p190_p0, %p184_p11 }
  0x22   :  { %194 = shalt.err (!%p191_p1)
}
  0x23   :  { %35 = dma.hbm_to_vmem [thread:$0]  %s332_s1, 64, %s33_s30, [#allocation6]  }
  0x24   :  { %239 = dma.done.wait [#allocation3], 256  }
  0x25   :  { %240 = vsyncadd [#allocation3], 4294967040 }
  0x26   :  { %241 = dma.done.wait [#allocation6], 64  }
  0x27   :  { %242 = vsyncadd [#allocation6], 4294967232  ;;  %v47_v0 = vlaneseq  ;;  %v46_v6 = vld [vmem:[%s333_s2] sm:$0x7]  ;;  %v83_v10 = vld [vmem:[#allocation5] sm:$0xf] }
  0x28   :  { %v85_v11 = vrot.slane %v83_v10, 2  ;;  %v44_v12 = vld [vmem:[#allocation2] sm:$0xff]  ;;  %v45_v13 = vld [vmem:[#allocation2 + $0x8] sm:$0xf]  ;;  %vm74_vm9 = vcmask 1043456   ;;  %vm99_vm11 = vcmask 1040384  }
  0x29   :  { %v48_v1 = vshrl.u32 %v47_v0, 7  ;;  %vm101_vm12 = vcmask 1041408   ;;  %s251_s1 = smov [#allocation7]  }
  0x2a   :  { %v87_v14 = vsub.f32 %v83_v10, %v85_v11  ;;  %s121_s2 = sshll.u32 %s251_s1, 4  ;;  %s122_s2 = int_to_ptr.vmem [resolvable:$true] %s121_s2 }
  0x2b   :  { %v52_v2 = vsub.s32 0, %v48_v1  ;;  %v58_v3 = vsub.s32 1, %v48_v1  ;;  %v66_v4 = vsub.s32 2, %v48_v1  ;;  %v49_v5 = vadd.s32 8, %v48_v1  ;;  %s195_s16 = scalar_lea.vmem %s122_s2, 16  ;;  %s199_s17 = scalar_lea.vmem %s122_s2, 32 }
  0x2c   :  { %v88_v19 = vand.u32 2147483647, %v87_v14  ;;  %p196_p2 = scmp.ne.s32.totalorder %s122_s2, %s195_s16  ;;  %p200_p3 = scmp.lt.s32.totalorder %s122_s2, %s122_s2 }
  0x2d   :  { %v53_v7 = vrot.slane %v46_v6, %v52_v2  ;;  %v59_v8 = vrot.slane %v46_v6, %v58_v3  ;;  %v67_v9 = vrot.slane %v46_v6, %v66_v4  ;;  %p201_p4 = scmp.lt.s32.totalorder %s199_s17, %s195_s16 }
  0x2e   :  { %v90_v22 = vrot.slane %v88_v19, 1 }
  0x2f   :  { %vm54_vm0 = vcmp.eq.s32.totalorder %v48_v1, %v53_v7  ;;  %vm55_vm1 = vcmp.eq.s32.totalorder %v49_v5, %v53_v7  ;;  %vm60_vm2 = vcmp.eq.s32.totalorder %v48_v1, %v59_v8  ;;  %vm61_vm3 = vcmp.eq.s32.totalorder %v49_v5, %v59_v8  ;;  %p202_p5 = por %p201_p4, %p200_p3 }
  0x30   :  { %vm62_vm4 = vmor %vm54_vm0, %vm60_vm2  ;;  %vm68_vm5 = vcmp.eq.s32.totalorder %v48_v1, %v67_v9  ;;  %vm69_vm6 = vcmp.eq.s32.totalorder %v49_v5, %v67_v9  ;;  %v92_v25 = vadd.f32 %v90_v22, %v88_v19 }
  0x31   :  { %vm63_vm7 = vmor %vm55_vm1, %vm61_vm3  ;;  %p203_p6 = pnand %p202_p5, %p196_p2 }
  0x32   :  { %vm70_vm8 = vmor %vm62_vm4, %vm68_vm5  ;;  %v97_v28 = vrot.slane %v92_v25, 7  ;;  %v93_v32 = vsub.f32 0.0, %v92_v25 }
  0x33   :  { %vm71_vm10 = vmor %vm63_vm7, %vm69_vm6  ;;  %v72_v15 = vsel %vm70_vm8, %v44_v12, 0.0 }
  0x34   :  { %v73_v16 = vsel %vm71_vm10, %v45_v13, 0.0  ;;  %94 = vst [vmem:[#allocation7] sm:$0x1] %v93_v32 }
  0x35   :  { %v75_v17 = vsel %vm74_vm9, %v73_v16, 0.0 }
  0x36   :  { %v76_v18 = vadd.f32 %v75_v17, %v72_v15 }
  0x38   :  { %v77_v20 = vrot.slane %v76_v18, 4 }
  0x3a   :  { %v78_v21 = vadd.f32 %v77_v20, %v76_v18 }
  0x3c   :  { %v79_v23 = vrot.slane %v78_v21, 2 }
  0x3e   :  { %v80_v24 = vadd.f32 %v79_v23, %v78_v21 }
  0x40   :  { %v81_v26 = vrot.slane %v80_v24, 1 }
  0x42   :  { %v82_v27 = vadd.f32 %v81_v26, %v80_v24 }
  0x44   :  { %v95_v29 = vsub.f32 %v92_v25, %v82_v27 }
  0x46   :  { %v100_v30 = vsel %vm99_vm11, %v95_v29, %v97_v28 }
  0x47   :  { %v102_v31 = vsel %vm101_vm12, %v100_v30, 0.0 }
  0x48   :  { %103 = vadd.xlane.f32.xlu0 %v102_v31 }
  0x49   :  { %206 = shalt.err (!%p203_p6)
}
  0x4a   :  { %s207_s20 = scalar_lea.hbm %s334_s3, 16 }
  0x4b   :  { %p208_p7 = scmp.ne.s32.totalorder %s334_s3, %s207_s20  ;;  %p211_p8 = scmp.lt.u32.totalorder %s207_s20, %s334_s3 }
  0x4d   :  { %p213_p9 = pnand %p211_p8, %p208_p7 }
  0x4f   :  { %216 = shalt.err (!%p213_p9)
}
  0x50   :  { %124 = dma.vmem_to_hbm [thread:$0]  %s122_s2, 16, %s334_s3, [#allocation4]   ;;  %v106_v33 = vand.u32 127, %v47_v0 }
  0x51   :  { %s252_s27 = smov [#allocation8]  }
  0x52   :  { %vm108_vm13 = vcmp.eq.s32.totalorder %v106_v33, 1  ;;  %s131_s28 = sshll.u32 %s252_s27, 4  ;;  %vm107_vm14 = vcmp.eq.s32.totalorder %v106_v33, 0  ;;  %s132_s28 = int_to_ptr.vmem [resolvable:$true] %s131_s28 }
  0x53   :  { %s217_s29 = scalar_lea.vmem %s132_s28, 16  ;;  %s221_s30 = scalar_lea.vmem %s132_s28, 32 }
  0x54   :  { %p218_p10 = scmp.ne.s32.totalorder %s132_s28, %s217_s29  ;;  %p222_p11 = scmp.lt.s32.totalorder %s132_s28, %s132_s28 }
  0x55   :  { %p223_p12 = scmp.lt.s32.totalorder %s221_s30, %s217_s29 }
  0x57   :  { %p224_p13 = por %p223_p12, %p222_p11 }
  0x59   :  { %p225_p0 = pnand %p224_p13, %p218_p10 }
  0xd5   :  { %v104_v34 = vpop.xlane.xlu0 %103 }
  0xd6   :  { %v109_v35 = vsel %vm108_vm13, %v104_v34, 0.0 }
  0xd7   :  { %v111_v36 = vrot.slane %v109_v35, 1 }
  0xd9   :  { %v113_v37 = vsel %vm107_vm14, %v104_v34, %v111_v36 }
  0xda   :  { %114 = vst [vmem:[#allocation8] sm:$0x1] %v113_v37 }
  0xdb   :  { %228 = shalt.err (!%p225_p0)
}
  0xdc   :  { %s229_s6 = scalar_lea.hbm %s335_s4, 16 }
  0xdd   :  { %p230_p1 = scmp.ne.s32.totalorder %s335_s4, %s229_s6  ;;  %p233_p2 = scmp.lt.u32.totalorder %s229_s6, %s335_s4 }
  0xdf   :  { %p235_p3 = pnand %p233_p2, %p230_p1 }
  0xe1   :  { %238 = shalt.err (!%p235_p3)
}
  0xe2   :  { %134 = dma.vmem_to_hbm [thread:$0]  %s132_s28, 16, %s335_s4, [#allocation9]  }
  0xe3   :  { %243 = dma.done.wait [#allocation4], 16  }
  0xe4   :  { %244 = vsyncadd [#allocation4], 4294967280 }
  0xe5   :  { %245 = dma.done.wait [#allocation9], 16  }
  0xe6   :  { %246 = vsyncadd [#allocation9], 4294967280 }
  0xe7   :  { %141 = vsyncpa [#allocation3], 1 }
  0xe8   :  { %142 = vsyncpa [#allocation6], 1 }
  0xe9   :  { %143 = vsyncpa [#allocation4], 1 }
  0xea   :  { %144 = vsyncpa [#allocation9], 1 }

</bundles_post_ra>
